<compile_context>
chip_gen: v7x
topology: tpu7x:2x2x1
jax: 0.10.0
libtpu: 0.0.40
codegen_flags: <defaults>
</compile_context>

<pallas_src>
import jax
import jax.numpy as jnp
from jax import lax
from jax.experimental import pallas as pl
from jax.experimental.pallas import tpu as pltpu

_HIDDEN1 = 64
_HIDDEN2 = 128
_P_WIDTH = 128   # lane-dense padded width of the spatial representation


def _round_up(x, m):
    return ((x + m - 1) // m) * m


# ---------------------------------------------------------------------------
# Pass 1: Linear(n_in,64)+ReLU -> Linear(64,128)+ReLU -> Linear(128,128pad)+ReLU
# Tiled over batch rows; weights stay resident (constant index_map).
# ---------------------------------------------------------------------------
def mlp_kernel(x_ref, w1_ref, b1_ref, w2_ref, b2_ref, w3_ref, b3_ref, p_ref):
    h1 = jnp.dot(x_ref[...], w1_ref[...], preferred_element_type=jnp.float32)
    h1 = jnp.maximum(h1 + b1_ref[...], 0.0)
    h2 = jnp.dot(h1, w2_ref[...], preferred_element_type=jnp.float32)
    h2 = jnp.maximum(h2 + b2_ref[...], 0.0)
    p = jnp.dot(h2, w3_ref[...], preferred_element_type=jnp.float32)
    p_ref[...] = jnp.maximum(p + b3_ref[...], 0.0)


# ---------------------------------------------------------------------------
# Pass 2: tiled pairwise squared distances + exp(-d) over a 2-D (i, j) grid.
# Only upper-triangular blocks are computed; lower blocks are zeroed and never
# consumed downstream (wrapper only reads the strict upper triangle).
# ---------------------------------------------------------------------------
def corr_kernel(p_row_ref, p_col_ref, corr_ref):
    i = pl.program_id(0)
    j = pl.program_id(1)

    @pl.when(j >= i)
    def _():
        pr = p_row_ref[...]                                 # (TB, 128)
        pc = p_col_ref[...]                                 # (TB, 128)
        sq_r = jnp.sum(pr * pr, axis=-1, keepdims=True)     # (TB, 1)
        sq_c = jnp.sum(pc * pc, axis=-1)                    # (TB,)
        # Gram via MXU, contracting the LAST dim of both operands: no explicit
        # p.T transpose / VMEM relayout is materialized.
        gram = lax.dot_general(pr, pc, (((1,), (1,)), ((), ())),
                               preferred_element_type=jnp.float32)
        # NOTE: the ||a||^2 + ||b||^2 - 2 a.b form can lose precision for
        # near-identical rows with large norms; clamp at 0 and validate at
        # 1e-5 tolerance (adequate at this model's scale).
        d = jnp.maximum(sq_r + sq_c[None, :] - 2.0 * gram, 0.0)
        corr_ref[...] = jnp.exp(-d)

    @pl.when(j < i)
    def _():
        corr_ref[...] = jnp.zeros_like(corr_ref)


def spacenet_forward(x, params, *, tile=512):
    """Returns (corr, p) matching torch SpaceNet.forward semantics.

    corr: (B*(B-1)//2,)  == exp(-pdist(p)**2)   (torch.pdist ordering, i < j)
    p:    (B, n_out)     == hidden spatial representation

    `tile` must be a multiple of 128; it is only used once the (padded) batch
    exceeds it. Default 512 keeps (tile x tile) f32 corr tiles + p slabs well
    inside v7x's 32 MiB scoped VMEM while amortizing per-grid-step overhead.
    """
    assert tile % 128 == 0, "corr tile must be a multiple of 128 lanes"
    w1, b1, w2, b2, w3, b3 = params
    B, n_in = x.shape
    n_out = w3.shape[1]

    # Pad the output layer to a lane-dense width of 128. Zero columns add 0 to
    # both the squared norms and the gram matrix, so corr is unchanged.
    w3p = jnp.zeros((w3.shape[0], _P_WIDTH), jnp.float32).at[:, :n_out].set(w3)
    b3p = jnp.zeros((1, _P_WIDTH), jnp.float32).at[:, :n_out].set(b3)

    # Tile choice: for small batches use a single full-extent block (rounded up
    # to a sublane multiple); otherwise use `tile`-sized (8,128)-aligned blocks.
    tb = min(tile, _round_up(B, 8))
    b_pad = _round_up(B, tb)
    if b_pad != B:
        x = jnp.pad(x, ((0, b_pad - B), (0, 0)))
    n_tiles = b_pad // tb

    # ---- pass 1: MLP once for the whole batch ----
    p_full = pl.pallas_call(
        mlp_kernel,
        out_shape=jax.ShapeDtypeStruct((b_pad, _P_WIDTH), jnp.float32),
        grid=(n_tiles,),
        in_specs=[
            pl.BlockSpec((tb, n_in), lambda i: (i, 0)),
            pl.BlockSpec((n_in, _HIDDEN1), lambda i: (0, 0)),
            pl.BlockSpec((1, _HIDDEN1), lambda i: (0, 0)),
            pl.BlockSpec((_HIDDEN1, _HIDDEN2), lambda i: (0, 0)),
            pl.BlockSpec((1, _HIDDEN2), lambda i: (0, 0)),
            pl.BlockSpec((_HIDDEN2, _P_WIDTH), lambda i: (0, 0)),
            pl.BlockSpec((1, _P_WIDTH), lambda i: (0, 0)),
        ],
        out_specs=pl.BlockSpec((tb, _P_WIDTH), lambda i: (i, 0)),
        compiler_params=pltpu.CompilerParams(
            dimension_semantics=("parallel",)),
    )(x, w1, b1, w2, b2, w3p, b3p)

    # ---- pass 2: tiled (i, j) correlation grid, upper-triangle only ----
    corr_full = pl.pallas_call(
        corr_kernel,
        out_shape=jax.ShapeDtypeStruct((b_pad, b_pad), jnp.float32),
        grid=(n_tiles, n_tiles),
        in_specs=[
            pl.BlockSpec((tb, _P_WIDTH), lambda i, j: (i, 0)),   # p rows
            pl.BlockSpec((tb, _P_WIDTH), lambda i, j: (j, 0)),   # p cols
        ],
        out_specs=pl.BlockSpec((tb, tb), lambda i, j: (i, j)),
        compiler_params=pltpu.CompilerParams(
            dimension_semantics=("parallel", "parallel")),
    )(p_full, p_full)

    # torch.pdist ordering == row-major strict upper triangle.
    # TODO(synk): for very large B, consume the (masked) dense corr matrix
    # downstream instead of this O(B^2) triu_indices gather in the wrapper.
    iu, ju = jnp.triu_indices(B, k=1)
    corr = corr_full[iu, ju]
    p = p_full[:B, :n_out]
    return corr, p


def init_params(key, n_in, n_out):
    """Deterministic parameter init (PyTorch-Linear-style uniform bounds)."""
    def linear_init(k, fan_in, fan_out):
        k_w, k_b = jax.random.split(k)
        bound = 1.0 / jnp.sqrt(jnp.float32(fan_in))
        w = jax.random.uniform(k_w, (fan_in, fan_out), jnp.float32, -bound, bound)
        b = jax.random.uniform(k_b, (1, fan_out), jnp.float32, -bound, bound)
        return w, b

    k1, k2, k3 = jax.random.split(key, 3)
    w1, b1 = linear_init(k1, n_in, _HIDDEN1)
    w2, b2 = linear_init(k2, _HIDDEN1, _HIDDEN2)
    w3, b3 = linear_init(k3, _HIDDEN2, n_out)
    return (w1, b1, w2, b2, w3, b3)


def _ref_forward(x, params):
    """Pure-JAX reference using the direct (a-b)^2 pdist form."""
    w1, b1, w2, b2, w3, b3 = params
    h1 = jnp.maximum(x @ w1 + b1, 0.0)
    h2 = jnp.maximum(h1 @ w2 + b2, 0.0)
    pr = jnp.maximum(h2 @ w3 + b3, 0.0)
    diff = pr[:, None, :] - pr[None, :, :]
    d = jnp.sum(diff * diff, axis=-1)
    iu, ju = jnp.triu_indices(pr.shape[0], k=1)
    return jnp.exp(-d[iu, ju]), pr


if __name__ == "__main__":
    key = jax.random.PRNGKey(0)
    k_x, k_p, k_x2 = jax.random.split(key, 3)

    n_in, n_out = 3, 16
    params = init_params(k_p, n_in, n_out)

    # Case 1: tiny batch (single-tile path).
    B1 = 8
    x1 = jax.random.normal(k_x, (B1, n_in), dtype=jnp.float32)
    corr1, p1 = spacenet_forward(x1, params)
    jax.block_until_ready((corr1, p1))
    corr1_ref, p1_ref = _ref_forward(x1, params)
    assert corr1.shape == (B1 * (B1 - 1) // 2,)
    assert p1.shape == (B1, n_out)
    assert jnp.allclose(corr1, corr1_ref, atol=1e-5)
    assert jnp.allclose(p1, p1_ref, atol=1e-5)

    # Case 2: non-multiple batch with a forced 2x2 corr grid (exercises batch
    # padding, the upper-triangle pl.when gating, and tiled BlockSpecs).
    B2 = 200
    x2 = jax.random.normal(k_x2, (B2, n_in), dtype=jnp.float32)
    corr2, p2 = spacenet_forward(x2, params, tile=128)
    jax.block_until_ready((corr2, p2))
    corr2_ref, p2_ref = _ref_forward(x2, params)
    assert corr2.shape == (B2 * (B2 - 1) // 2,)
    assert p2.shape == (B2, n_out)
    assert jnp.allclose(corr2, corr2_ref, atol=1e-5)
    assert jnp.allclose(p2, p2_ref, atol=1e-5)

    print("KERNEL_OK")
</pallas_src>

<mosaic_0001>
module attributes {stable_mosaic.version = 11 : i64} {
  func.func @mlp_kernel(%arg0: i32, %arg1: memref<8x3xf32, #tpu.memory_space<vmem>>, %arg2: memref<3x64xf32, #tpu.memory_space<vmem>>, %arg3: memref<1x64xf32, #tpu.memory_space<vmem>>, %arg4: memref<64x128xf32, #tpu.memory_space<vmem>>, %arg5: memref<1x128xf32, #tpu.memory_space<vmem>>, %arg6: memref<128x128xf32, #tpu.memory_space<vmem>>, %arg7: memref<1x128xf32, #tpu.memory_space<vmem>>, %arg8: memref<8x128xf32, #tpu.memory_space<vmem>>) attributes {dimension_semantics = [#tpu.dimension_semantics<parallel>], iteration_bounds = array<i64: 1>, scalar_prefetch = 0 : i64, scratch_operands = 0 : i64, tpu.core_type = #tpu.core_type<tc>, window_params = [{transform_indices = @transform_0, window_bounds = array<i64: 8, 3>}, {pipeline_mode = #tpu.pipeline_mode<synchronous>, transform_indices = @transform_1, window_bounds = array<i64: 3, 64>}, {pipeline_mode = #tpu.pipeline_mode<synchronous>, transform_indices = @transform_2, window_bounds = array<i64: 1, 64>}, {pipeline_mode = #tpu.pipeline_mode<synchronous>, transform_indices = @transform_3, window_bounds = array<i64: 64, 128>}, {pipeline_mode = #tpu.pipeline_mode<synchronous>, transform_indices = @transform_4, window_bounds = array<i64: 1, 128>}, {pipeline_mode = #tpu.pipeline_mode<synchronous>, transform_indices = @transform_5, window_bounds = array<i64: 128, 128>}, {pipeline_mode = #tpu.pipeline_mode<synchronous>, transform_indices = @transform_6, window_bounds = array<i64: 1, 128>}, {transform_indices = @transform_7, window_bounds = array<i64: 8, 128>}]} {
    %c0 = arith.constant 0 : index
    %c0_0 = arith.constant 0 : index
    %0 = vector.load %arg1[%c0, %c0_0] : memref<8x3xf32, #tpu.memory_space<vmem>>, vector<8x3xf32>
    %c0_1 = arith.constant 0 : index
    %c0_2 = arith.constant 0 : index
    %1 = vector.load %arg2[%c0_1, %c0_2] : memref<3x64xf32, #tpu.memory_space<vmem>>, vector<3x64xf32>
    %cst = arith.constant dense<0.000000e+00> : vector<8x64xf32>
    %2 = tpu.matmul %0, %1, %cst {dimension_numbers = #tpu.dot_dimension_numbers<[1], [0], [0], [1], [0, 0, 1, 1], [], []>} : vector<8x3xf32>, vector<3x64xf32>, vector<8x64xf32> -> vector<8x64xf32>
    %c0_3 = arith.constant 0 : index
    %c0_4 = arith.constant 0 : index
    %3 = vector.load %arg3[%c0_3, %c0_4] : memref<1x64xf32, #tpu.memory_space<vmem>>, vector<1x64xf32>
    %4 = vector.broadcast %3 : vector<1x64xf32> to vector<8x64xf32>
    %5 = arith.addf %2, %4 : vector<8x64xf32>
    %cst_5 = arith.constant 0.000000e+00 : f32
    %6 = vector.broadcast %cst_5 : f32 to vector<8x64xf32>
    %7 = arith.maximumf %5, %6 : vector<8x64xf32>
    %c0_6 = arith.constant 0 : index
    %c0_7 = arith.constant 0 : index
    %8 = vector.load %arg4[%c0_6, %c0_7] : memref<64x128xf32, #tpu.memory_space<vmem>>, vector<64x128xf32>
    %cst_8 = arith.constant dense<0.000000e+00> : vector<8x128xf32>
    %9 = tpu.matmul %7, %8, %cst_8 {dimension_numbers = #tpu.dot_dimension_numbers<[1], [0], [0], [1], [0, 0, 1, 1], [], []>} : vector<8x64xf32>, vector<64x128xf32>, vector<8x128xf32> -> vector<8x128xf32>
    %c0_9 = arith.constant 0 : index
    %c0_10 = arith.constant 0 : index
    %10 = vector.load %arg5[%c0_9, %c0_10] : memref<1x128xf32, #tpu.memory_space<vmem>>, vector<1x128xf32>
    %11 = vector.broadcast %10 : vector<1x128xf32> to vector<8x128xf32>
    %12 = arith.addf %9, %11 : vector<8x128xf32>
    %cst_11 = arith.constant 0.000000e+00 : f32
    %13 = vector.broadcast %cst_11 : f32 to vector<8x128xf32>
    %14 = arith.maximumf %12, %13 : vector<8x128xf32>
    %c0_12 = arith.constant 0 : index
    %c0_13 = arith.constant 0 : index
    %15 = vector.load %arg6[%c0_12, %c0_13] : memref<128x128xf32, #tpu.memory_space<vmem>>, vector<128x128xf32>
    %cst_14 = arith.constant dense<0.000000e+00> : vector<8x128xf32>
    %16 = tpu.matmul %14, %15, %cst_14 {dimension_numbers = #tpu.dot_dimension_numbers<[1], [0], [0], [1], [0, 0, 1, 1], [], []>} : vector<8x128xf32>, vector<128x128xf32>, vector<8x128xf32> -> vector<8x128xf32>
    %c0_15 = arith.constant 0 : index
    %c0_16 = arith.constant 0 : index
    %17 = vector.load %arg7[%c0_15, %c0_16] : memref<1x128xf32, #tpu.memory_space<vmem>>, vector<1x128xf32>
    %18 = vector.broadcast %17 : vector<1x128xf32> to vector<8x128xf32>
    %19 = arith.addf %16, %18 : vector<8x128xf32>
    %cst_17 = arith.constant 0.000000e+00 : f32
    %20 = vector.broadcast %cst_17 : f32 to vector<8x128xf32>
    %21 = arith.maximumf %19, %20 : vector<8x128xf32>
    %c0_18 = arith.constant 0 : index
    %c0_19 = arith.constant 0 : index
    %22 = vector.load %arg8[%c0_18, %c0_19] : memref<8x128xf32, #tpu.memory_space<vmem>>, vector<8x128xf32>
    tpu.vector_store %arg8[%c0_18, %c0_19], %21 {strides = array<i32>} : memref<8x128xf32, #tpu.memory_space<vmem>>, vector<8x128xf32>,
    return
  }
  func.func @transform_0(%arg0: i32) -> (i32, i32) {
    %c0_i32 = arith.constant 0 : i32
    %c0_i32_0 = arith.constant 0 : i32
    return %arg0, %c0_i32 : i32, i32
  }
  func.func @transform_1(%arg0: i32) -> (i32, i32) {
    %c0_i32 = arith.constant 0 : i32
    %c0_i32_0 = arith.constant 0 : i32
    %c0_i32_1 = arith.constant 0 : i32
    return %c0_i32, %c0_i32_0 : i32, i32
  }
  func.func @transform_2(%arg0: i32) -> (i32, i32) {
    %c0_i32 = arith.constant 0 : i32
    %c0_i32_0 = arith.constant 0 : i32
    %c0_i32_1 = arith.constant 0 : i32
    return %c0_i32, %c0_i32_0 : i32, i32
  }
  func.func @transform_3(%arg0: i32) -> (i32, i32) {
    %c0_i32 = arith.constant 0 : i32
    %c0_i32_0 = arith.constant 0 : i32
    %c0_i32_1 = arith.constant 0 : i32
    return %c0_i32, %c0_i32_0 : i32, i32
  }
  func.func @transform_4(%arg0: i32) -> (i32, i32) {
    %c0_i32 = arith.constant 0 : i32
    %c0_i32_0 = arith.constant 0 : i32
    %c0_i32_1 = arith.constant 0 : i32
    return %c0_i32, %c0_i32_0 : i32, i32
  }
  func.func @transform_5(%arg0: i32) -> (i32, i32) {
    %c0_i32 = arith.constant 0 : i32
    %c0_i32_0 = arith.constant 0 : i32
    %c0_i32_1 = arith.constant 0 : i32
    return %c0_i32, %c0_i32_0 : i32, i32
  }
  func.func @transform_6(%arg0: i32) -> (i32, i32) {
    %c0_i32 = arith.constant 0 : i32
    %c0_i32_0 = arith.constant 0 : i32
    %c0_i32_1 = arith.constant 0 : i32
    return %c0_i32, %c0_i32_0 : i32, i32
  }
  func.func @transform_7(%arg0: i32) -> (i32, i32) {
    %c0_i32 = arith.constant 0 : i32
    %c0_i32_0 = arith.constant 0 : i32
    return %arg0, %c0_i32 : i32, i32
  }
}

</mosaic_0001>

<bundles_post_ra>
// kernel: tpu_custom_call.1
= control target key start
LH: loop header
LB: loop body
LE: loop exit
PB: predicated region body
PF: predicated region fallthrough
CT: control target
= control target key end

     0   :  { %12 = vsyncpa [#allocation3], 0  ;;  %s667_s0 = inlined_call_operand.vmem [shape: f32[8,3], index: 0, kind: input, shape index: {}]   ;;  %s668_s1 = inlined_call_operand.vmem [shape: f32[3,64], index: 1, kind: input, shape index: {}]   ;;  %s669_s2 = inlined_call_operand.vmem [shape: f32[1,64], index: 2, kind: input, shape index: {}]   ;;  %s670_s3 = inlined_call_operand.hbm [shape: f32[64,128], index: 3, kind: input, shape index: {}]   ;;  %s671_s4 = inlined_call_operand.vmem [shape: f32[1,128], index: 4, kind: input, shape index: {}]   ;;  %s672_s5 = inlined_call_operand.hbm [shape: f32[128,128], index: 5, kind: input, shape index: {}]   ;;  %s673_s6 = inlined_call_operand.vmem [shape: f32[1,128], index: 6, kind: input, shape index: {}]   ;;  %s674_s7 = inlined_call_operand.hbm [shape: f32[8,128], index: 7, kind: output, shape index: {}]  }
   0x1   :  { %13 = vsyncpa [#allocation6], 0 }
   0x2   :  { %14 = vsyncpa [#allocation4], 0  ;;  %s553_s24 = smov [#allocation2]   ;;  %s481_s28 = scalar_lea.hbm %s670_s3, 1024 }
   0x3   :  { %s26_s25 = sshll.u32 %s553_s24, 4  ;;  %p482_p0 = scmp.ne.s32.totalorder %s670_s3, %s481_s28  ;;  %s27_s25 = int_to_ptr.vmem [resolvable:$true] %s26_s25 }
   0x4   :  { %p485_p1 = scmp.lt.u32.totalorder %s481_s28, %s670_s3 }
   0x6   :  { %p487_p2 = pnand %p485_p1, %p482_p0 }
   0x8   :  { %490 = shalt.err (!%p487_p2)
}
   0x9   :  { %s491_s10 = scalar_lea.vmem %s27_s25, 1024  ;;  %p496_p4 = scmp.lt.s32.totalorder %s27_s25, %s27_s25 }
   0xa   :  { %p492_p3 = scmp.ne.s32.totalorder %s27_s25, %s491_s10  ;;  %p497_p5 = scmp.lt.s32.totalorder %s491_s10, %s491_s10 }
   0xc   :  { %p498_p6 = por %p497_p5, %p496_p4 }
   0xe   :  { %p499_p7 = pnand %p498_p6, %p492_p3 }
  0x10   :  { %502 = shalt.err (!%p499_p7)
}
  0x11   :  { %s554_s11 = smov 128   ;;  %s555_s12 = smov 8  }
  0x12   :  { %32 = dma.hbm_to_vmem [thread:$0]  %s670_s3, 1024, %s27_s25, [#allocation3], %s554_s11, %s554_s11, %s555_s12  }
  0x13   :  { %s556_s15 = smov [#allocation5]   ;;  %s503_s19 = scalar_lea.hbm %s672_s5, 2048 }
  0x14   :  { %s40_s16 = sshll.u32 %s556_s15, 4  ;;  %p504_p8 = scmp.ne.s32.totalorder %s672_s5, %s503_s19  ;;  %s41_s16 = int_to_ptr.vmem [resolvable:$true] %s40_s16 }
  0x15   :  { %p507_p9 = scmp.lt.u32.totalorder %s503_s19, %s672_s5 }
  0x17   :  { %p509_p10 = pnand %p507_p9, %p504_p8 }
  0x19   :  { %512 = shalt.err (!%p509_p10)
}
  0x1a   :  { %s513_s24 = scalar_lea.vmem %s41_s16, 2048  ;;  %p518_p12 = scmp.lt.s32.totalorder %s41_s16, %s41_s16 }
  0x1b   :  { %p514_p11 = scmp.ne.s32.totalorder %s41_s16, %s513_s24  ;;  %p519_p13 = scmp.lt.s32.totalorder %s513_s24, %s513_s24 }
  0x1d   :  { %p520_p0 = por %p519_p13, %p518_p12 }
  0x1f   :  { %p521_p1 = pnand %p520_p0, %p514_p11 }
  0x21   :  { %524 = shalt.err (!%p521_p1)
}
  0x22   :  { %46 = dma.hbm_to_vmem [thread:$0]  %s672_s5, 2048, %s41_s16, [#allocation6], %s554_s11, %s554_s11, %s555_s12  }
  0x23   :  { %547 = dma.done.wait [#allocation3], 1024  }
  0x24   :  { %548 = vsyncadd [#allocation3], 4294966272 }
  0x25   :  { %549 = dma.done.wait [#allocation6], 2048  }
  0x26   :  { %550 = vsyncadd [#allocation6], 4294965248  ;;  %v557_v0 = vmov 0.0   ;;  %vm558_vm0 = vmmov 0   ;;  %v559_v1 = vmov 0.0|0.0   ;;  %vm68_vm1 = vcmask 1042432  }
  0x27   :  { %378 = vmatprep.subr.mxu1 %v557_v0  ;;  %380 = vmatprep.mubr.msk.f32.mxu1 %vm558_vm0, %v557_v0  ;;  %vm64_vm2 = vcmask 23552   ;;  %v56_v2 = vld [vmem:[%s668_s1] sm:$0x7]  ;;  %v144_v5 = vld [vmem:[#allocation2 + $0x8] sm:$0xff]  ;;  %v145_v6 = vld [vmem:[#allocation2 + $0x10] sm:$0xff]  ;;  %vm158_vm3 = vcmask 523264  }
  0x28   :  { %449 = vmatprep.subr.bf16.mxu0 %v559_v1  ;;  %434 = vmatprep.mubr.msk.f32.mxu0 %vm558_vm0, %v557_v0  ;;  %v55_v3 = vld [vmem:[%s667_s0] sm:$0xff]  ;;  %v146_v7 = vld [vmem:[#allocation2 + $0x18] sm:$0xff]  ;;  %v148_v11 = vld [vmem:[#allocation2 + $0x28] sm:$0xff]  ;;  %s560_s9 = smov [#allocation7]  }
  0x29   :  { %v143_v4 = vld [vmem:[#allocation2] sm:$0xff]  ;;  %379 = vmatpush3.msk.msra.mxu1 %vm68_vm1, %v56_v2  ;;  %v441_v9 = vpack.c.bf16 %v146_v7, %v145_v6  ;;  %v149_v13 = vld [vmem:[#allocation2 + $0x30] sm:$0xff]  ;;  %v150_v14 = vld [vmem:[#allocation2 + $0x38] sm:$0xff]  ;;  %s334_s10 = sshll.u32 %s560_s9, 4  ;;  %s335_s10 = int_to_ptr.vmem [resolvable:$true] %s334_s10 }
  0x2a   :  { %381 = vmatmul.mubr.msk.f32.vlgmr.msra.gmra.mrb[0].mxu1 %vm64_vm2, %v55_v3  ;;  %437 = vmatprep.subr.bf16.mxu1 %v559_v1  ;;  %v438_v8 = vpack.c.bf16 %v144_v5, %v143_v4  ;;  %v147_v10 = vld [vmem:[#allocation2 + $0x20] sm:$0xff]  ;;  %v447_v15 = vpack.c.bf16 %v150_v14, %v149_v13  ;;  %v234_v17 = vld [vmem:[#allocation5 + $0x8] sm:$0xff]  ;;  %v235_v18 = vld [vmem:[#allocation5 + $0x10] sm:$0xff]  ;;  %s525_s11 = scalar_lea.vmem %s335_s10, 128  ;;  %p530_p3 = scmp.lt.s32.totalorder %s335_s10, %s335_s10 }
  0x2b   :  { %399 = vmatprep.mubr.msk.f32.mxu1 %vm558_vm0, %v557_v0  ;;  %v444_v12 = vpack.c.bf16 %v148_v11, %v147_v10  ;;  %v233_v16 = vld [vmem:[#allocation5] sm:$0xff]  ;;  %v236_v20 = vld [vmem:[#allocation5 + $0x18] sm:$0xff]  ;;  %v238_v23 = vld [vmem:[#allocation5 + $0x28] sm:$0xff]  ;;  %p526_p2 = scmp.ne.s32.totalorder %s335_s10, %s525_s11  ;;  %p531_p4 = scmp.lt.s32.totalorder %s525_s11, %s525_s11 }
  0x2c   :  { %439 = vmatpush3.bf16.msra.mxu1 %v438_v8  ;;  %v450_v19 = vpack.c.bf16 %v234_v17, %v233_v16  ;;  %v453_v21 = vpack.c.bf16 %v236_v20, %v235_v18  ;;  %v237_v22 = vld [vmem:[#allocation5 + $0x20] sm:$0xff]  ;;  %v239_v25 = vld [vmem:[#allocation5 + $0x30] sm:$0xff]  ;;  %v240_v26 = vld [vmem:[#allocation5 + $0x38] sm:$0xff] }
  0x2d   :  { %440 = vmatprep.subr.bf16.mxu1 %v559_v1  ;;  %v456_v24 = vpack.c.bf16 %v238_v23, %v237_v22  ;;  %v459_v27 = vpack.c.bf16 %v240_v26, %v239_v25  ;;  %v241_v28 = vld [vmem:[#allocation5 + $0x40] sm:$0xff]  ;;  %v242_v29 = vld [vmem:[#allocation5 + $0x48] sm:$0xff]  ;;  %v243_v31 = vld [vmem:[#allocation5 + $0x50] sm:$0xff]  ;;  %p532_p5 = por %p531_p4, %p530_p3 }
  0x2e   :  { %451 = vmatpush3.bf16.msra.mxu0 %v450_v19  ;;  %v462_v30 = vpack.c.bf16 %v242_v29, %v241_v28  ;;  %v244_v32 = vld [vmem:[#allocation5 + $0x58] sm:$0xff]  ;;  %v245_v34 = vld [vmem:[#allocation5 + $0x60] sm:$0xff]  ;;  %v246_v35 = vld [vmem:[#allocation5 + $0x68] sm:$0xff] }
  0x2f   :  { %452 = vmatprep.subr.bf16.mxu0 %v559_v1  ;;  %v465_v33 = vpack.c.bf16 %v244_v32, %v243_v31  ;;  %v468_v36 = vpack.c.bf16 %v246_v35, %v245_v34  ;;  %v344_v37 = vld [vmem:[%s669_s2] ss:$0 sm:$0xff]  ;;  %v247_v42 = vld [vmem:[#allocation5 + $0x70] sm:$0xff]  ;;  %v248_v43 = vld [vmem:[#allocation5 + $0x78] sm:$0xff]  ;;  %p533_p6 = pnand %p532_p5, %p526_p2 }
  0x30   :  { %442 = vmatpush3.bf16.msra.mxu1 %v441_v9  ;;  %v471_v44 = vpack.c.bf16 %v248_v43, %v247_v42  ;;  %v347_v45 = vld [vmem:[%s671_s4] ss:$0 sm:$0xff] }
  0x31   :  { %443 = vmatprep.subr.bf16.mxu1 %v559_v1  ;;  %v349_v50 = vld [vmem:[%s673_s6] ss:$0 sm:$0xff] }
  0x32   :  { %454 = vmatpush3.bf16.msra.mxu0 %v453_v21 }
  0x33   :  { %455 = vmatprep.subr.bf16.mxu0 %v559_v1 }
  0x34   :  { %445 = vmatpush3.bf16.msra.mxu1 %v444_v12 }
  0x35   :  { %446 = vmatprep.subr.bf16.mxu1 %v559_v1 }
  0x36   :  { %457 = vmatpush3.bf16.msra.mxu0 %v456_v24 }
  0x37   :  { %458 = vmatprep.subr.bf16.mxu0 %v559_v1 }
  0x38   :  { %448 = vmatpush3.bf16.msra.mxu1 %v447_v15 }
  0x3a   :  { %460 = vmatpush3.bf16.msra.mxu0 %v459_v27 }
  0x3b   :  { %461 = vmatprep.subr.bf16.mxu0 %v559_v1 }
  0x3e   :  { %463 = vmatpush3.bf16.msra.mxu0 %v462_v30 }
  0x3f   :  { %464 = vmatprep.subr.bf16.mxu0 %v559_v1 }
  0x42   :  { %466 = vmatpush3.bf16.msra.mxu0 %v465_v33 }
  0x43   :  { %467 = vmatprep.subr.bf16.mxu0 %v559_v1 }
  0x46   :  { %469 = vmatpush3.bf16.msra.mxu0 %v468_v36 }
  0x47   :  { %470 = vmatprep.subr.bf16.mxu0 %v559_v1 }
  0x4a   :  { %472 = vmatpush3.bf16.msra.mxu0 %v471_v44 }
  0xfd   :  { %v138_v38 = vpop.f32.mrb[0].mxu1 }
  0xfe   :  { %v139_v39 = vadd.f32 %v344_v37, %v138_v38  ;;  %v382_v40 = vpop.f32.mrb[1].mxu1 }
 0x100   :  { %v142_v41 = vmax.f32 %v139_v39, 0.0 }
 0x102   :  { %400 = vmatmul.mubr.msk.f32.vlgmr.msra.gmra.mrb[2].mxu1 %vm158_vm3, %v142_v41 }
 0x1d5   :  { %v228_v46 = vpop.f32.mrb[2].mxu1 }
 0x1d6   :  { %v229_v47 = vadd.f32 %v347_v45, %v228_v46  ;;  %v401_v48 = vpop.f32.mrb[3].mxu1 }
 0x1d8   :  { %v232_v49 = vmax.f32 %v229_v47, 0.0 }
 0x1da   :  { %435 = vmatmul.mubr.f32.vlgmr.msra.gmra.mrb[0].mxu0 %v232_v49 }
 0x2ad   :  { %v322_v51 = vpop.f32.mrb[0].mxu0 }
 0x2ae   :  { %v323_v52 = vadd.f32 %v349_v50, %v322_v51  ;;  %v436_v53 = vpop.f32.mrb[1].mxu0 }
 0x2b0   :  { %v326_v54 = vmax.f32 %v323_v52, 0.0 }
 0x2b2   :  { %327 = vst [vmem:[#allocation7] sm:$0xff] %v326_v54 }
 0x2b3   :  { %536 = shalt.err (!%p533_p6)
}
 0x2b4   :  { %s537_s13 = scalar_lea.hbm %s674_s7, 128 }
 0x2b5   :  { %p538_p7 = scmp.ne.s32.totalorder %s674_s7, %s537_s13  ;;  %p541_p8 = scmp.lt.u32.totalorder %s537_s13, %s674_s7 }
 0x2b7   :  { %p543_p9 = pnand %p541_p8, %p538_p7 }
 0x2b9   :  { %546 = shalt.err (!%p543_p9)
}
 0x2ba   :  { %337 = dma.vmem_to_hbm [thread:$0]  %s335_s10, 128, %s674_s7, [#allocation4]  }
 0x2bb   :  { %551 = dma.done.wait [#allocation4], 128  }
 0x2bc   :  { %552 = vsyncadd [#allocation4], 4294967168 }
 0x2bd   :  { %341 = vsyncpa [#allocation3], 1 }
 0x2be   :  { %342 = vsyncpa [#allocation6], 1 }
 0x2bf   :  { %343 = vsyncpa [#allocation4], 1 }

</bundles_post_ra>
